<compile_context>
chip_gen: v6e
topology: v6e:2x2x1
jax: 0.10.0
libtpu: 0.0.40
codegen_flags: <defaults>
</compile_context>

<pallas_src>
import functools

import jax
import jax.numpy as jnp
from jax.experimental import pallas as pl
from jax.experimental.pallas import tpu as pltpu


def _round_up(x, m):
    return (x + m - 1) // m * m


def _kan_kernel(n_layers, x_ref, *refs):
    """Fused MLP forward for one batch tile.

    x_ref: (batch_tile, in_pad) f32 (cast to bf16 in-kernel)
    refs = (w1, b1, ..., wL, bL, out_ref); W blocks bf16, biases f32, output f32.
    Weights/biases are resident as full (single-buffered) blocks; only batch is tiled.
    """
    o_ref = refs[-1]
    wb = refs[:-1]

    h = x_ref[...].astype(jnp.bfloat16)           # f32 -> bf16 on the VPU (free under MXU slack)
    for li in range(n_layers):
        w = wb[2 * li][...]                       # bf16 (MXU operand)
        b = wb[2 * li + 1][...]                   # f32
        acc = jnp.dot(h, w, preferred_element_type=jnp.float32) + b   # f32 accumulate + bias
        if li < n_layers - 1:                     # ReLU on hidden layers only
            h = jnp.maximum(acc, 0.0).astype(jnp.bfloat16)
        else:
            h = acc
    o_ref[...] = h.astype(o_ref.dtype)


def preprocess_kan_params(params):
    """One-time preprocessing (call OUTSIDE the hot path).

    Pads every layer width (in and out) up to a multiple of 128 lanes, casts W to bf16
    (MXU operand) and b to f32 (epilogue on the f32 accumulator). Zero pads are exact
    through x@W+b and ReLU, so numerics are unchanged.
    """
    prepped = []
    for (w, b) in params:
        d_in, d_out = w.shape
        in_pad = _round_up(d_in, 128)
        out_pad = _round_up(d_out, 128)
        wp = jnp.pad(w, ((0, in_pad - d_in), (0, out_pad - d_out))).astype(jnp.bfloat16)
        bp = jnp.pad(jnp.reshape(b, (1, -1)).astype(jnp.float32),
                     ((0, 0), (0, out_pad - d_out)))
        prepped.append((wp, bp))
    return prepped


def _vmem_capacity_bytes():
    try:
        return int(pltpu.get_tpu_info().vmem_capacity_bytes)
    except Exception:
        return 64 << 20   # conservative (v7x-sized) fallback


def _pick_batch_tile(B, vmem_cap):
    if vmem_cap <= (64 << 20):
        # v7x-like: 64 MiB VMEM, 2 TensorCores -> keep >=2 grid steps when B > 256 so
        # dimension_semantics=("parallel",) can shard across both cores.
        return _round_up(B, 16) if B <= 256 else 256
    # v5e/v6e: 128 MiB VMEM, 1 TensorCore -> bigger tiles, fewer grid steps.
    return _round_up(B, 16) if B <= 1024 else 512


def kan_forward(x, prepped_params, out_dim, *, batch_tile=None, single_buffer_weights=True):
    """Run the KAN MLP forward pass with a single fused Pallas kernel.

    x:              (B, input_dim) float32
    prepped_params: output of preprocess_kan_params (padded bf16 W, padded f32 b)
    out_dim:        true (unpadded) output width
    returns         (B, out_dim) float32
    """
    B, in_dim = x.shape
    n_layers = len(prepped_params)
    in_pad = prepped_params[0][0].shape[0]
    out_pad = prepped_params[-1][0].shape[1]

    vmem_cap = _vmem_capacity_bytes()
    if batch_tile is None:
        batch_tile = _pick_batch_tile(B, vmem_cap)
    batch_tile = _round_up(max(1, min(batch_tile, _round_up(B, 16))), 16)
    B_pad = _round_up(B, batch_tile)

    # Pad x rows to a tile multiple and columns to the padded input width. No dtype cast
    # here: the f32 x is DMA'd as-is and cast to bf16 inside the kernel.
    if B_pad != B or in_pad != in_dim:
        x = jnp.pad(x, ((0, B_pad - B), (0, in_pad - in_dim)))

    grid = (B_pad // batch_tile,)

    flat_wb = []
    for (w, b) in prepped_params:
        flat_wb.append(w)
        flat_wb.append(b)

    # Tightened VMEM estimate: single-buffered weights/biases + double-buffered f32 x/out
    # tiles + the largest live pair of consecutive activation buffers (bf16 h + f32 acc).
    w_bufs = 1 if single_buffer_weights else 2
    wb_bytes = sum(w.size * 2 + b.size * 4 for (w, b) in prepped_params)
    x_tile_bytes = 2 * batch_tile * in_pad * 4
    o_tile_bytes = 2 * batch_tile * out_pad * 4
    dims = [in_pad] + [w.shape[1] for (w, _) in prepped_params]
    act_bytes = max(batch_tile * (dims[i] * 2 + dims[i + 1] * 4) for i in range(len(dims) - 1))
    est = w_bufs * wb_bytes + x_tile_bytes + o_tile_bytes + act_bytes
    vmem_limit = int(min(max(int(est * 1.5), 16 << 20), vmem_cap * 3 // 4))

    kernel = functools.partial(_kan_kernel, n_layers)

    def _run(single_buf):
        def const_spec(shape):
            # Grid-invariant block: constant index_map; single-buffer it when supported.
            if single_buf:
                try:
                    return pl.BlockSpec(shape, lambda i: (0, 0),
                                        pipeline_mode=pl.Buffered(1))
                except TypeError:
                    return pl.BlockSpec(shape, lambda i: (0, 0))
            return pl.BlockSpec(shape, lambda i: (0, 0))

        in_specs = [pl.BlockSpec((batch_tile, in_pad), lambda i: (i, 0))]
        for (w, b) in prepped_params:
            in_specs.append(const_spec(w.shape))
            in_specs.append(const_spec(b.shape))
        out_specs = pl.BlockSpec((batch_tile, out_pad), lambda i: (i, 0))

        return pl.pallas_call(
            kernel,
            out_shape=jax.ShapeDtypeStruct((B_pad, out_pad), jnp.float32),
            grid=grid,
            in_specs=in_specs,
            out_specs=out_specs,
            compiler_params=pltpu.CompilerParams(
                dimension_semantics=("parallel",),
                vmem_limit_bytes=vmem_limit,
            ),
        )(x, *flat_wb)

    if single_buffer_weights:
        try:
            y = _run(True)
        except Exception:
            # Fall back to default (double-buffered) pipelining if Buffered(1) is rejected.
            y = _run(False)
    else:
        y = _run(False)

    # Only materialize the slice when padding was actually applied.
    if B_pad != B or out_pad != out_dim:
        y = y[:B, :out_dim]
    return y


def init_kan_params(key, input_dim, hidden_dims, output_dim):
    """Deterministic parameter init matching the module's shapes.

    nn.Linear(in, out) has weight (out, in), bias (out,). We store W as (in, out) and
    b as (1, out) for the kernel; numerics are equivalent (x @ W + b == x @ weight.T + bias).
    """
    dims = [input_dim] + list(hidden_dims) + [output_dim]
    params = []
    for li in range(len(dims) - 1):
        d_in, d_out = dims[li], dims[li + 1]
        key, kw, kb = jax.random.split(key, 3)
        bound = 1.0 / jnp.sqrt(jnp.float32(d_in))   # same scale as torch default init
        w = jax.random.uniform(kw, (d_in, d_out), jnp.float32, -bound, bound)
        b = jax.random.uniform(kb, (1, d_out), jnp.float32, -bound, bound)
        params.append((w, b))
    return params


def kan_reference(x, params):
    h = x
    for li, (w, b) in enumerate(params):
        h = h @ w + b
        if li < len(params) - 1:
            h = jnp.maximum(h, 0.0)
    return h


# TODO(synk): fit/predict/save_predictions (Adam training loop, checkpoint I/O, .mat export)
# are host-side utilities with no Pallas equivalent; only the forward pass is implemented.

if __name__ == "__main__":
    # Small shapes consistent with the module: flattened field -> MLP.
    B = 16
    input_dim = 256          # e.g. a flattened 16x16 field
    hidden_dims = [128, 128]
    output_dim = 64

    key = jax.random.PRNGKey(0)
    key, kx = jax.random.split(key)
    x = jax.random.normal(kx, (B, input_dim), jnp.float32)

    params = init_kan_params(key, input_dim, hidden_dims, output_dim)

    # One-time preprocessing (pad widths to 128, bf16 weights) outside the hot path.
    prepped = preprocess_kan_params(params)

    y = kan_forward(x, prepped, output_dim)
    y = jax.block_until_ready(y)

    y_ref = kan_reference(x, params)
    assert y.shape == (B, output_dim)
    # bf16 matmul operands (f32 accumulation) vs the f32 reference -> loosened tolerance.
    assert jnp.allclose(y, y_ref, atol=5e-2, rtol=5e-2), float(jnp.max(jnp.abs(y - y_ref)))

    print("KERNEL_OK")
</pallas_src>

<mosaic_0001>
module attributes {stable_mosaic.version = 11 : i64} {
  func.func @_kan_kernel(%arg0: i32, %arg1: memref<16x256xf32, #tpu.memory_space<vmem>>, %arg2: memref<256x128xbf16, #tpu.memory_space<vmem>>, %arg3: memref<1x128xf32, #tpu.memory_space<vmem>>, %arg4: memref<128x128xbf16, #tpu.memory_space<vmem>>, %arg5: memref<1x128xf32, #tpu.memory_space<vmem>>, %arg6: memref<128x128xbf16, #tpu.memory_space<vmem>>, %arg7: memref<1x128xf32, #tpu.memory_space<vmem>>, %arg8: memref<16x128xf32, #tpu.memory_space<vmem>>) attributes {dimension_semantics = [#tpu.dimension_semantics<parallel>], iteration_bounds = array<i64: 1>, scalar_prefetch = 0 : i64, scratch_operands = 0 : i64, tpu.core_type = #tpu.core_type<tc>, window_params = [{transform_indices = @transform_0, window_bounds = array<i64: 16, 256>}, {pipeline_mode = #tpu.pipeline_mode<synchronous>, transform_indices = @transform_1, window_bounds = array<i64: 256, 128>}, {pipeline_mode = #tpu.pipeline_mode<synchronous>, transform_indices = @transform_2, window_bounds = array<i64: 1, 128>}, {pipeline_mode = #tpu.pipeline_mode<synchronous>, transform_indices = @transform_3, window_bounds = array<i64: 128, 128>}, {pipeline_mode = #tpu.pipeline_mode<synchronous>, transform_indices = @transform_4, window_bounds = array<i64: 1, 128>}, {pipeline_mode = #tpu.pipeline_mode<synchronous>, transform_indices = @transform_5, window_bounds = array<i64: 128, 128>}, {pipeline_mode = #tpu.pipeline_mode<synchronous>, transform_indices = @transform_6, window_bounds = array<i64: 1, 128>}, {transform_indices = @transform_7, window_bounds = array<i64: 16, 128>}]} {
    %c0 = arith.constant 0 : index
    %c0_0 = arith.constant 0 : index
    %0 = vector.load %arg1[%c0, %c0_0] : memref<16x256xf32, #tpu.memory_space<vmem>>, vector<16x256xf32>
    %1 = arith.truncf %0 : vector<16x256xf32> to vector<16x256xbf16>
    %c0_1 = arith.constant 0 : index
    %c0_2 = arith.constant 0 : index
    %2 = vector.load %arg2[%c0_1, %c0_2] : memref<256x128xbf16, #tpu.memory_space<vmem>>, vector<256x128xbf16>
    %c0_3 = arith.constant 0 : index
    %c0_4 = arith.constant 0 : index
    %3 = vector.load %arg3[%c0_3, %c0_4] : memref<1x128xf32, #tpu.memory_space<vmem>>, vector<1x128xf32>
    %cst = arith.constant dense<0.000000e+00> : vector<16x128xf32>
    %4 = tpu.matmul %1, %2, %cst {dimension_numbers = #tpu.dot_dimension_numbers<[1], [0], [0], [1], [0, 0, 1, 1], [], []>} : vector<16x256xbf16>, vector<256x128xbf16>, vector<16x128xf32> -> vector<16x128xf32>
    %5 = vector.broadcast %3 : vector<1x128xf32> to vector<16x128xf32>
    %6 = arith.addf %4, %5 : vector<16x128xf32>
    %cst_5 = arith.constant 0.000000e+00 : f32
    %7 = vector.broadcast %cst_5 : f32 to vector<16x128xf32>
    %8 = arith.maximumf %6, %7 : vector<16x128xf32>
    %9 = arith.truncf %8 : vector<16x128xf32> to vector<16x128xbf16>
    %c0_6 = arith.constant 0 : index
    %c0_7 = arith.constant 0 : index
    %10 = vector.load %arg4[%c0_6, %c0_7] : memref<128x128xbf16, #tpu.memory_space<vmem>>, vector<128x128xbf16>
    %c0_8 = arith.constant 0 : index
    %c0_9 = arith.constant 0 : index
    %11 = vector.load %arg5[%c0_8, %c0_9] : memref<1x128xf32, #tpu.memory_space<vmem>>, vector<1x128xf32>
    %cst_10 = arith.constant dense<0.000000e+00> : vector<16x128xf32>
    %12 = tpu.matmul %9, %10, %cst_10 {dimension_numbers = #tpu.dot_dimension_numbers<[1], [0], [0], [1], [0, 0, 1, 1], [], []>} : vector<16x128xbf16>, vector<128x128xbf16>, vector<16x128xf32> -> vector<16x128xf32>
    %13 = vector.broadcast %11 : vector<1x128xf32> to vector<16x128xf32>
    %14 = arith.addf %12, %13 : vector<16x128xf32>
    %cst_11 = arith.constant 0.000000e+00 : f32
    %15 = vector.broadcast %cst_11 : f32 to vector<16x128xf32>
    %16 = arith.maximumf %14, %15 : vector<16x128xf32>
    %17 = arith.truncf %16 : vector<16x128xf32> to vector<16x128xbf16>
    %c0_12 = arith.constant 0 : index
    %c0_13 = arith.constant 0 : index
    %18 = vector.load %arg6[%c0_12, %c0_13] : memref<128x128xbf16, #tpu.memory_space<vmem>>, vector<128x128xbf16>
    %c0_14 = arith.constant 0 : index
    %c0_15 = arith.constant 0 : index
    %19 = vector.load %arg7[%c0_14, %c0_15] : memref<1x128xf32, #tpu.memory_space<vmem>>, vector<1x128xf32>
    %cst_16 = arith.constant dense<0.000000e+00> : vector<16x128xf32>
    %20 = tpu.matmul %17, %18, %cst_16 {dimension_numbers = #tpu.dot_dimension_numbers<[1], [0], [0], [1], [0, 0, 1, 1], [], []>} : vector<16x128xbf16>, vector<128x128xbf16>, vector<16x128xf32> -> vector<16x128xf32>
    %21 = vector.broadcast %19 : vector<1x128xf32> to vector<16x128xf32>
    %22 = arith.addf %20, %21 : vector<16x128xf32>
    %c0_17 = arith.constant 0 : index
    %c0_18 = arith.constant 0 : index
    %23 = vector.load %arg8[%c0_17, %c0_18] : memref<16x128xf32, #tpu.memory_space<vmem>>, vector<16x128xf32>
    tpu.vector_store %arg8[%c0_17, %c0_18], %22 {strides = array<i32>} : memref<16x128xf32, #tpu.memory_space<vmem>>, vector<16x128xf32>,
    return
  }
  func.func @transform_0(%arg0: i32) -> (i32, i32) {
    %c0_i32 = arith.constant 0 : i32
    %c0_i32_0 = arith.constant 0 : i32
    return %arg0, %c0_i32 : i32, i32
  }
  func.func @transform_1(%arg0: i32) -> (i32, i32) {
    %c0_i32 = arith.constant 0 : i32
    %c0_i32_0 = arith.constant 0 : i32
    %c0_i32_1 = arith.constant 0 : i32
    return %c0_i32, %c0_i32_0 : i32, i32
  }
  func.func @transform_2(%arg0: i32) -> (i32, i32) {
    %c0_i32 = arith.constant 0 : i32
    %c0_i32_0 = arith.constant 0 : i32
    %c0_i32_1 = arith.constant 0 : i32
    return %c0_i32, %c0_i32_0 : i32, i32
  }
  func.func @transform_3(%arg0: i32) -> (i32, i32) {
    %c0_i32 = arith.constant 0 : i32
    %c0_i32_0 = arith.constant 0 : i32
    %c0_i32_1 = arith.constant 0 : i32
    return %c0_i32, %c0_i32_0 : i32, i32
  }
  func.func @transform_4(%arg0: i32) -> (i32, i32) {
    %c0_i32 = arith.constant 0 : i32
    %c0_i32_0 = arith.constant 0 : i32
    %c0_i32_1 = arith.constant 0 : i32
    return %c0_i32, %c0_i32_0 : i32, i32
  }
  func.func @transform_5(%arg0: i32) -> (i32, i32) {
    %c0_i32 = arith.constant 0 : i32
    %c0_i32_0 = arith.constant 0 : i32
    %c0_i32_1 = arith.constant 0 : i32
    return %c0_i32, %c0_i32_0 : i32, i32
  }
  func.func @transform_6(%arg0: i32) -> (i32, i32) {
    %c0_i32 = arith.constant 0 : i32
    %c0_i32_0 = arith.constant 0 : i32
    %c0_i32_1 = arith.constant 0 : i32
    return %c0_i32, %c0_i32_0 : i32, i32
  }
  func.func @transform_7(%arg0: i32) -> (i32, i32) {
    %c0_i32 = arith.constant 0 : i32
    %c0_i32_0 = arith.constant 0 : i32
    return %arg0, %c0_i32 : i32, i32
  }
}

module attributes {stable_mosaic.version = 11 : i64} {
  func.func @_kan_kernel(%arg0: i32, %arg1: memref<16x256xf32, #tpu.memory_space<vmem>>, %arg2: memref<256x128xbf16, #tpu.memory_space<vmem>>, %arg3: memref<1x128xf32, #tpu.memory_space<vmem>>, %arg4: memref<128x128xbf16, #tpu.memory_space<vmem>>, %arg5: memref<1x128xf32, #tpu.memory_space<vmem>>, %arg6: memref<128x128xbf16, #tpu.memory_space<vmem>>, %arg7: memref<1x128xf32, #tpu.memory_space<vmem>>, %arg8: memref<16x128xf32, #tpu.memory_space<vmem>>) attributes {dimension_semantics = [#tpu.dimension_semantics<parallel>], iteration_bounds = array<i64: 1>, scalar_prefetch = 0 : i64, scratch_operands = 0 : i64, tpu.core_type = #tpu.core_type<tc>, window_params = [{transform_indices = @transform_0, window_bounds = array<i64: 16, 256>}, {pipeline_mode = #tpu.pipeline_mode<synchronous>, transform_indices = @transform_1, window_bounds = array<i64: 256, 128>}, {pipeline_mode = #tpu.pipeline_mode<synchronous>, transform_indices = @transform_2, window_bounds = array<i64: 1, 128>}, {pipeline_mode = #tpu.pipeline_mode<synchronous>, transform_indices = @transform_3, window_bounds = array<i64: 128, 128>}, {pipeline_mode = #tpu.pipeline_mode<synchronous>, transform_indices = @transform_4, window_bounds = array<i64: 1, 128>}, {pipeline_mode = #tpu.pipeline_mode<synchronous>, transform_indices = @transform_5, window_bounds = array<i64: 128, 128>}, {pipeline_mode = #tpu.pipeline_mode<synchronous>, transform_indices = @transform_6, window_bounds = array<i64: 1, 128>}, {transform_indices = @transform_7, window_bounds = array<i64: 16, 128>}]} {
    %c0 = arith.constant 0 : index
    %c0_0 = arith.constant 0 : index
    %0 = vector.load %arg1[%c0, %c0_0] : memref<16x256xf32, #tpu.memory_space<vmem>>, vector<16x256xf32>
    %1 = arith.truncf %0 : vector<16x256xf32> to vector<16x256xbf16>
    %c0_1 = arith.constant 0 : index
    %c0_2 = arith.constant 0 : index
    %2 = vector.load %arg2[%c0_1, %c0_2] : memref<256x128xbf16, #tpu.memory_space<vmem>>, vector<256x128xbf16>
    %c0_3 = arith.constant 0 : index
    %c0_4 = arith.constant 0 : index
    %3 = vector.load %arg3[%c0_3, %c0_4] : memref<1x128xf32, #tpu.memory_space<vmem>>, vector<1x128xf32>
    %cst = arith.constant dense<0.000000e+00> : vector<16x128xf32>
    %4 = tpu.matmul %1, %2, %cst {dimension_numbers = #tpu.dot_dimension_numbers<[1], [0], [0], [1], [0, 0, 1, 1], [], []>} : vector<16x256xbf16>, vector<256x128xbf16>, vector<16x128xf32> -> vector<16x128xf32>
    %5 = vector.broadcast %3 : vector<1x128xf32> to vector<16x128xf32>
    %6 = arith.addf %4, %5 : vector<16x128xf32>
    %cst_5 = arith.constant 0.000000e+00 : f32
    %7 = vector.broadcast %cst_5 : f32 to vector<16x128xf32>
    %8 = arith.maximumf %6, %7 : vector<16x128xf32>
    %9 = arith.truncf %8 : vector<16x128xf32> to vector<16x128xbf16>
    %c0_6 = arith.constant 0 : index
    %c0_7 = arith.constant 0 : index
    %10 = vector.load %arg4[%c0_6, %c0_7] : memref<128x128xbf16, #tpu.memory_space<vmem>>, vector<128x128xbf16>
    %c0_8 = arith.constant 0 : index
    %c0_9 = arith.constant 0 : index
    %11 = vector.load %arg5[%c0_8, %c0_9] : memref<1x128xf32, #tpu.memory_space<vmem>>, vector<1x128xf32>
    %cst_10 = arith.constant dense<0.000000e+00> : vector<16x128xf32>
    %12 = tpu.matmul %9, %10, %cst_10 {dimension_numbers = #tpu.dot_dimension_numbers<[1], [0], [0], [1], [0, 0, 1, 1], [], []>} : vector<16x128xbf16>, vector<128x128xbf16>, vector<16x128xf32> -> vector<16x128xf32>
    %13 = vector.broadcast %11 : vector<1x128xf32> to vector<16x128xf32>
    %14 = arith.addf %12, %13 : vector<16x128xf32>
    %cst_11 = arith.constant 0.000000e+00 : f32
    %15 = vector.broadcast %cst_11 : f32 to vector<16x128xf32>
    %16 = arith.maximumf %14, %15 : vector<16x128xf32>
    %17 = arith.truncf %16 : vector<16x128xf32> to vector<16x128xbf16>
    %c0_12 = arith.constant 0 : index
    %c0_13 = arith.constant 0 : index
    %18 = vector.load %arg6[%c0_12, %c0_13] : memref<128x128xbf16, #tpu.memory_space<vmem>>, vector<128x128xbf16>
    %c0_14 = arith.constant 0 : index
    %c0_15 = arith.constant 0 : index
    %19 = vector.load %arg7[%c0_14, %c0_15] : memref<1x128xf32, #tpu.memory_space<vmem>>, vector<1x128xf32>
    %cst_16 = arith.constant dense<0.000000e+00> : vector<16x128xf32>
    %20 = tpu.matmul %17, %18, %cst_16 {dimension_numbers = #tpu.dot_dimension_numbers<[1], [0], [0], [1], [0, 0, 1, 1], [], []>} : vector<16x128xbf16>, vector<128x128xbf16>, vector<16x128xf32> -> vector<16x128xf32>
    %21 = vector.broadcast %19 : vector<1x128xf32> to vector<16x128xf32>
    %22 = arith.addf %20, %21 : vector<16x128xf32>
    %c0_17 = arith.constant 0 : index
    %c0_18 = arith.constant 0 : index
    %23 = vector.load %arg8[%c0_17, %c0_18] : memref<16x128xf32, #tpu.memory_space<vmem>>, vector<16x128xf32>
    tpu.vector_store %arg8[%c0_17, %c0_18], %22 {strides = array<i32>} : memref<16x128xf32, #tpu.memory_space<vmem>>, vector<16x128xf32>,
    return
  }
  func.func @transform_0(%arg0: i32) -> (i32, i32) {
    %c0_i32 = arith.constant 0 : i32
    %c0_i32_0 = arith.constant 0 : i32
    return %arg0, %c0_i32 : i32, i32
  }
  func.func @transform_1(%arg0: i32) -> (i32, i32) {
    %c0_i32 = arith.constant 0 : i32
    %c0_i32_0 = arith.constant 0 : i32
    %c0_i32_1 = arith.constant 0 : i32
    return %c0_i32, %c0_i32_0 : i32, i32
  }
  func.func @transform_2(%arg0: i32) -> (i32, i32) {
    %c0_i32 = arith.constant 0 : i32
    %c0_i32_0 = arith.constant 0 : i32
    %c0_i32_1 = arith.constant 0 : i32
    return %c0_i32, %c0_i32_0 : i32, i32
  }
  func.func @transform_3(%arg0: i32) -> (i32, i32) {
    %c0_i32 = arith.constant 0 : i32
    %c0_i32_0 = arith.constant 0 : i32
    %c0_i32_1 = arith.constant 0 : i32
    return %c0_i32, %c0_i32_0 : i32, i32
  }
  func.func @transform_4(%arg0: i32) -> (i32, i32) {
    %c0_i32 = arith.constant 0 : i32
    %c0_i32_0 = arith.constant 0 : i32
    %c0_i32_1 = arith.constant 0 : i32
    return %c0_i32, %c0_i32_0 : i32, i32
  }
  func.func @transform_5(%arg0: i32) -> (i32, i32) {
    %c0_i32 = arith.constant 0 : i32
    %c0_i32_0 = arith.constant 0 : i32
    %c0_i32_1 = arith.constant 0 : i32
    return %c0_i32, %c0_i32_0 : i32, i32
  }
  func.func @transform_6(%arg0: i32) -> (i32, i32) {
    %c0_i32 = arith.constant 0 : i32
    %c0_i32_0 = arith.constant 0 : i32
    %c0_i32_1 = arith.constant 0 : i32
    return %c0_i32, %c0_i32_0 : i32, i32
  }
  func.func @transform_7(%arg0: i32) -> (i32, i32) {
    %c0_i32 = arith.constant 0 : i32
    %c0_i32_0 = arith.constant 0 : i32
    return %arg0, %c0_i32 : i32, i32
  }
}

</mosaic_0001>

<bundles_post_ra>
// kernel: tpu_custom_call.1
= control target key start
LH: loop header
LB: loop body
LE: loop exit
PB: predicated region body
PF: predicated region fallthrough
CT: control target
= control target key end

     0   :  { %12 = vsyncpa [#allocation3], 0  ;;  %s888_s0 = inlined_call_operand.hbm [shape: f32[16,256], index: 0, kind: input, shape index: {}]   ;;  %s889_s1 = inlined_call_operand.hbm [shape: bf16[256,128], index: 1, kind: input, shape index: {}]   ;;  %s890_s2 = inlined_call_operand.vmem [shape: f32[1,128], index: 2, kind: input, shape index: {}]   ;;  %s891_s3 = inlined_call_operand.hbm [shape: bf16[128,128], index: 3, kind: input, shape index: {}]   ;;  %s892_s4 = inlined_call_operand.vmem [shape: f32[1,128], index: 4, kind: input, shape index: {}]   ;;  %s893_s5 = inlined_call_operand.hbm [shape: bf16[128,128], index: 5, kind: input, shape index: {}]   ;;  %s894_s6 = inlined_call_operand.vmem [shape: f32[1,128], index: 6, kind: input, shape index: {}]   ;;  %s895_s7 = inlined_call_operand.hbm [shape: f32[16,128], index: 7, kind: output, shape index: {}]  }
   0x1   :  { %13 = vsyncpa [#allocation6], 0 }
   0x2   :  { %14 = vsyncpa [#allocation9], 0 }
   0x3   :  { %15 = vsyncpa [#allocation4], 0  ;;  %s784_s24 = smov [#allocation5]  }
   0x4   :  { %s33_s25 = sshll.u32 %s784_s24, 4  ;;  %s34_s25 = int_to_ptr.vmem [resolvable:$true] %s33_s25 }
   0x5   :  { %s684_s26 = scalar_lea.vmem %s34_s25, 2048  ;;  %p689_p1 = scmp.lt.s32.totalorder %s34_s25, %s34_s25 }
   0x6   :  { %p685_p0 = scmp.ne.s32.totalorder %s34_s25, %s684_s26  ;;  %p690_p2 = scmp.lt.s32.totalorder %s684_s26, %s684_s26 }
   0x8   :  { %p691_p3 = por %p690_p2, %p689_p1 }
   0xa   :  { %p692_p4 = pnand %p691_p3, %p685_p0 }
   0xc   :  { %695 = shalt.err (!%p692_p4)
}
   0xd   :  { %s785_s27 = smov 64   ;;  %s786_s28 = smov 4  }
   0xe   :  { %39 = dma.hbm_to_vmem [thread:$0]  %s889_s1, 2048, %s34_s25, [#allocation6], %s785_s27, %s785_s27, %s786_s28  }
   0xf   :  { %s787_s8 = smov [#allocation2]  }
  0x10   :  { %s21_s9 = sshll.u32 %s787_s8, 4  ;;  %s22_s9 = int_to_ptr.vmem [resolvable:$true] %s21_s9 }
  0x11   :  { %s704_s10 = scalar_lea.vmem %s22_s9, 512  ;;  %p709_p6 = scmp.lt.s32.totalorder %s22_s9, %s22_s9 }
  0x12   :  { %p705_p5 = scmp.ne.s32.totalorder %s22_s9, %s704_s10  ;;  %p710_p7 = scmp.lt.s32.totalorder %s704_s10, %s704_s10 }
  0x14   :  { %p711_p8 = por %p710_p7, %p709_p6 }
  0x16   :  { %p712_p9 = pnand %p711_p8, %p705_p5 }
  0x18   :  { %715 = shalt.err (!%p712_p9)
}
  0x19   :  { %s788_s11 = smov 256   ;;  %s789_s12 = smov 16  }
  0x1a   :  { %27 = dma.hbm_to_vmem [thread:$0]  %s888_s0, 512, %s22_s9, [#allocation3], %s788_s11, %s788_s11, %s789_s12  }
  0x1b   :  { %s790_s15 = smov [#allocation7]   ;;  %s791_s17 = smov [#allocation8]  }
  0x1c   :  { %s47_s16 = sshll.u32 %s790_s15, 4  ;;  %s61_s1 = sshll.u32 %s791_s17, 4  ;;  %s48_s16 = int_to_ptr.vmem [resolvable:$true] %s47_s16  ;;  %s62_s1 = int_to_ptr.vmem [resolvable:$true] %s61_s1 }
  0x1d   :  { %s724_s18 = scalar_lea.vmem %s48_s16, 1024  ;;  %p729_p11 = scmp.lt.s32.totalorder %s48_s16, %s48_s16 }
  0x1e   :  { %p725_p10 = scmp.ne.s32.totalorder %s48_s16, %s724_s18  ;;  %p730_p12 = scmp.lt.s32.totalorder %s724_s18, %s724_s18 }
  0x20   :  { %p731_p13 = por %p730_p12, %p729_p11 }
  0x22   :  { %p732_p0 = pnand %p731_p13, %p725_p10 }
  0x24   :  { %735 = shalt.err (!%p732_p0)
}
  0x25   :  { %53 = dma.hbm_to_vmem [thread:$0]  %s891_s3, 1024, %s48_s16, [#allocation6], %s785_s27, %s785_s27, %s786_s28  }
  0x26   :  { %s744_s0 = scalar_lea.vmem %s62_s1, 1024  ;;  %p749_p2 = scmp.lt.s32.totalorder %s62_s1, %s62_s1 }
  0x27   :  { %p745_p1 = scmp.ne.s32.totalorder %s62_s1, %s744_s0  ;;  %p750_p3 = scmp.lt.s32.totalorder %s744_s0, %s744_s0 }
  0x29   :  { %p751_p4 = por %p750_p3, %p749_p2 }
  0x2b   :  { %p752_p5 = pnand %p751_p4, %p745_p1 }
  0x2d   :  { %755 = shalt.err (!%p752_p5)
}
  0x2e   :  { %67 = dma.hbm_to_vmem [thread:$0]  %s893_s5, 1024, %s62_s1, [#allocation9], %s785_s27, %s785_s27, %s786_s28  }
  0x2f   :  { %776 = dma.done.wait [#allocation3], 512  }
  0x30   :  { %777 = vsyncadd [#allocation3], 4294966784 }
  0x31   :  { %778 = dma.done.wait [#allocation6], 3072  }
  0x32   :  { %779 = vsyncadd [#allocation6], 4294964224 }
  0x33   :  { %780 = dma.done.wait [#allocation9], 1024  }
  0x34   :  { %781 = vsyncadd [#allocation9], 4294966272  ;;  %v792_v0 = vmov 0.0   ;;  %v644_v1 = vld [vmem:[#allocation5 + $0x78] sm:$0xff]   ;;  %v646_v3 = vld [vmem:[#allocation5 + $0x70] sm:$0xff]   ;;  %vm793_vm0 = vmmov 0  }
  0x35   :  { %591 = vmatprep.subr.bf16.mxu1 %v792_v0  ;;  %v645_v2 = vld [vmem:[#allocation5 + $0x38] sm:$0xff]   ;;  %551 = vmatprep.subr.bf16.mxu0 %v644_v1  ;;  %v647_v4 = vld [vmem:[#allocation5 + $0x30] sm:$0xff]   ;;  %v648_v5 = vld [vmem:[#allocation5 + $0x68] sm:$0xff]   ;;  %s794_s26 = smov [#allocation10]  }
  0x36   :  { %552 = vmatpush3.bf16.msra.mxu0 %v645_v2  ;;  %v649_v6 = vld [vmem:[#allocation5 + $0x28] sm:$0xff]   ;;  %v650_v7 = vld [vmem:[#allocation5 + $0x60] sm:$0xff]   ;;  %v652_v9 = vld [vmem:[#allocation5 + $0x58] sm:$0xff]   ;;  %607 = vmatprep.mubr.msk.bf16.mxu1 %vm793_vm0, %v792_v0  ;;  %s502_s27 = sshll.u32 %s794_s26, 4  ;;  %s503_s27 = int_to_ptr.vmem [resolvable:$true] %s502_s27 }
  0x37   :  { %553 = vmatprep.subr.bf16.mxu0 %v646_v3  ;;  %v651_v8 = vld [vmem:[#allocation5 + $0x20] sm:$0xff]   ;;  %v653_v10 = vld [vmem:[#allocation5 + $0x18] sm:$0xff]   ;;  %v654_v11 = vld [vmem:[#allocation5 + $0x50] sm:$0xff]   ;;  %p761_p7 = scmp.lt.s32.totalorder %s503_s27, %s503_s27 }
  0x38   :  { %v84_v12 = vld [vmem:[#allocation2 + $0x8] sm:$0xff]  ;;  %v86_v13 = vld [vmem:[#allocation2 + $0x18] sm:$0xff]  ;;  %v655_v14 = vld [vmem:[#allocation5 + $0x10] sm:$0xff]  }
  0x39   :  { %v88_v15 = vpack.c.bf16 %v86_v13, %v84_v12  ;;  %v660_v16 = vld [vmem:[#allocation7 + $0x38] sm:$0xff]   ;;  %v656_v17 = vld [vmem:[#allocation5 + $0x48] sm:$0xff]   ;;  %v661_v18 = vld [vmem:[#allocation7 + $0x30] sm:$0xff]  }
  0x3a   :  { %554 = vmatpush3.bf16.msra.mxu0 %v647_v4  ;;  %592 = vmatpush3.bf16.msra.mxu1 %v660_v16  ;;  %v657_v19 = vld [vmem:[#allocation5 + $0x8] sm:$0xff]   ;;  %v658_v20 = vld [vmem:[#allocation5 + $0x40] sm:$0xff]   ;;  %v85_v24 = vld [vmem:[#allocation2 + $0x10] sm:$0xff] }
  0x3b   :  { %555 = vmatprep.subr.bf16.mxu0 %v648_v5  ;;  %256 = vmatprep.mubr.bf16.mxu0 %v88_v15  ;;  %v662_v21 = vld [vmem:[#allocation7 + $0x28] sm:$0xff]   ;;  %v659_v22 = vld [vmem:[#allocation5] sm:$0xff]   ;;  %v664_v27 = vld [vmem:[#allocation7 + $0x18] sm:$0xff]  }
  0x3c   :  { %593 = vmatprep.subr.bf16.mxu1 %v792_v0  ;;  %v83_v23 = vld [vmem:[#allocation2] sm:$0xff]  ;;  %v665_v28 = vld [vmem:[#allocation7 + $0x10] sm:$0xff]   ;;  %v666_v29 = vld [vmem:[#allocation7 + $0x8] sm:$0xff]  }
  0x3d   :  { %v663_v25 = vld [vmem:[#allocation7 + $0x20] sm:$0xff]   ;;  %v87_v26 = vpack.c.bf16 %v85_v24, %v83_v23  ;;  %v668_v31 = vld [vmem:[#allocation8 + $0x38] sm:$0xff]   ;;  %v669_v32 = vld [vmem:[#allocation8 + $0x30] sm:$0xff]  }
  0x3e   :  { %556 = vmatpush3.bf16.msra.mxu0 %v649_v6  ;;  %594 = vmatpush3.bf16.msra.mxu1 %v661_v18  ;;  %v667_v30 = vld [vmem:[#allocation7] sm:$0xff]   ;;  %v670_v33 = vld [vmem:[#allocation8 + $0x28] sm:$0xff]   ;;  %v672_v35 = vld [vmem:[#allocation8 + $0x18] sm:$0xff]  }
  0x3f   :  { %557 = vmatprep.subr.bf16.mxu0 %v650_v7  ;;  %595 = vmatprep.subr.bf16.mxu1 %v792_v0  ;;  %v671_v34 = vld [vmem:[#allocation8 + $0x20] sm:$0xff]   ;;  %v673_v48 = vld [vmem:[#allocation8 + $0x10] sm:$0xff]   ;;  %v674_v49 = vld [vmem:[#allocation8 + $0x8] sm:$0xff]  }
  0x40   :  { %v516_v39 = vld [vmem:[%s890_s2] ss:$0 sm:$0xff] }
  0x41   :  { %v675_v50 = vld [vmem:[#allocation8] sm:$0xff]  }
  0x42   :  { %558 = vmatpush3.bf16.msra.mxu0 %v651_v8  ;;  %596 = vmatpush3.bf16.msra.mxu1 %v662_v21  ;;  %v533_v51 = vld [vmem:[%s892_s4] ss:$0 sm:$0xff]  ;;  %s756_s4 = scalar_lea.vmem %s503_s27, 256 }
  0x43   :  { %559 = vmatprep.subr.bf16.mxu0 %v652_v9  ;;  %597 = vmatprep.subr.bf16.mxu1 %v792_v0  ;;  %v542_v61 = vld [vmem:[%s894_s6] ss:$0 sm:$0xff]  ;;  %p757_p6 = scmp.ne.s32.totalorder %s503_s27, %s756_s4  ;;  %p762_p8 = scmp.lt.s32.totalorder %s756_s4, %s756_s4 }
  0x45   :  { %p763_p9 = por %p762_p8, %p761_p7 }
  0x46   :  { %560 = vmatpush3.bf16.msra.mxu0 %v653_v10  ;;  %598 = vmatpush3.bf16.msra.mxu1 %v663_v25 }
  0x47   :  { %561 = vmatprep.subr.bf16.mxu0 %v654_v11  ;;  %599 = vmatprep.subr.bf16.mxu1 %v792_v0  ;;  %p764_p10 = pnand %p763_p9, %p757_p6 }
  0x4a   :  { %562 = vmatpush3.bf16.msra.mxu0 %v655_v14  ;;  %600 = vmatpush3.bf16.msra.mxu1 %v664_v27 }
  0x4b   :  { %563 = vmatprep.subr.bf16.mxu0 %v656_v17  ;;  %601 = vmatprep.subr.bf16.mxu1 %v792_v0 }
  0x4e   :  { %564 = vmatpush3.bf16.msra.mxu0 %v657_v19  ;;  %602 = vmatpush3.bf16.msra.mxu1 %v665_v28 }
  0x4f   :  { %565 = vmatprep.subr.bf16.mxu0 %v658_v20  ;;  %603 = vmatprep.subr.bf16.mxu1 %v792_v0 }
  0x52   :  { %566 = vmatpush3.bf16.msra.mxu0 %v659_v22  ;;  %604 = vmatpush3.bf16.msra.mxu1 %v666_v29 }
  0x53   :  { %611 = vmatprep.subr.bf16.mxu0 %v792_v0  ;;  %605 = vmatprep.subr.bf16.mxu1 %v792_v0 }
  0x55   :  { %257 = vmatmul.mubr.bf16.vlgmr.msra.gmra.mxu0 %v87_v26 }
  0x56   :  { %606 = vmatpush3.bf16.msra.mxu1 %v667_v30  ;;  %627 = vmatprep.mubr.msk.bf16.mxu0 %vm793_vm0, %v792_v0 }
  0x57   :  { %612 = vmatpush3.bf16.msra.mxu0 %v668_v31 }
  0x58   :  { %613 = vmatprep.subr.bf16.mxu0 %v792_v0 }
  0x5b   :  { %614 = vmatpush3.bf16.msra.mxu0 %v669_v32 }
  0x5c   :  { %615 = vmatprep.subr.bf16.mxu0 %v792_v0 }
  0x5f   :  { %616 = vmatpush3.bf16.msra.mxu0 %v670_v33 }
  0x60   :  { %617 = vmatprep.subr.bf16.mxu0 %v792_v0 }
  0x63   :  { %618 = vmatpush3.bf16.msra.mxu0 %v671_v34 }
  0x64   :  { %619 = vmatprep.subr.bf16.mxu0 %v792_v0 }
  0x67   :  { %620 = vmatpush3.bf16.msra.mxu0 %v672_v35 }
  0x68   :  { %621 = vmatprep.subr.bf16.mxu0 %v792_v0 }
  0x6b   :  { %622 = vmatpush3.bf16.msra.mxu0 %v673_v48 }
  0x6c   :  { %623 = vmatprep.subr.bf16.mxu0 %v792_v0 }
  0x6f   :  { %624 = vmatpush3.bf16.msra.mxu0 %v674_v49 }
  0x70   :  { %625 = vmatprep.subr.bf16.mxu0 %v792_v0 }
  0x73   :  { %626 = vmatpush3.bf16.msra.mxu0 %v675_v50 }
 0x115   :  { %v567_v36 = vpop.f32.mrf.mxu0 }
 0x117   :  { %v568_v37 = vpop.f32.mrf.mxu0 }
 0x118   :  { %v569_v38 = vadd.f32 %v568_v37, %v567_v36 }
 0x119   :  { %v570_v40 = vpop.f32.mrf.mxu0 }
 0x11a   :  { %v259_v42 = vadd.f32 %v569_v38, %v516_v39 }
 0x11b   :  { %v571_v41 = vpop.f32.mrf.mxu0 }
 0x11c   :  { %v572_v43 = vadd.f32 %v571_v41, %v570_v40  ;;  %v265_v45 = vmax.f32 %v259_v42, 0.0 }
 0x11e   :  { %v262_v44 = vadd.f32 %v572_v43, %v516_v39 }
 0x120   :  { %v266_v46 = vmax.f32 %v262_v44, 0.0 }
 0x122   :  { %v267_v47 = vpack.c.bf16 %v266_v46, %v265_v45 }
 0x124   :  { %608 = vmatmul.mubr.bf16.vlgmr.msra.gmra.mxu1 %v267_v47 }
 0x1e4   :  { %v373_v52 = vpop.f32.mrf.mxu1 }
 0x1e5   :  { %v374_v54 = vadd.f32 %v533_v51, %v373_v52 }
 0x1e6   :  { %v609_v53 = vpop.f32.mrf.mxu1 }
 0x1e7   :  { %v380_v58 = vmax.f32 %v374_v54, 0.0 }
 0x1e8   :  { %v376_v55 = vpop.f32.mrf.mxu1 }
 0x1e9   :  { %v377_v56 = vadd.f32 %v533_v51, %v376_v55 }
 0x1ea   :  { %v610_v57 = vpop.f32.mrf.mxu1 }
 0x1eb   :  { %v381_v59 = vmax.f32 %v377_v56, 0.0 }
 0x1ed   :  { %v382_v60 = vpack.c.bf16 %v381_v59, %v380_v58 }
 0x1ef   :  { %628 = vmatmul.mubr.bf16.vlgmr.msra.gmra.mxu0 %v382_v60 }
 0x2af   :  { %v488_v62 = vpop.f32.mrf.mxu0 }
 0x2b0   :  { %v489_v63 = vadd.f32 %v542_v61, %v488_v62 }
 0x2b1   :  { %v629_v0 = vpop.f32.mrf.mxu0 }
 0x2b2   :  { %495 = vst [vmem:[#allocation10] sm:$0xff] %v489_v63 }
 0x2b3   :  { %v491_v1 = vpop.f32.mrf.mxu0 }
 0x2b4   :  { %v492_v2 = vadd.f32 %v542_v61, %v491_v1 }
 0x2b5   :  { %v630_v3 = vpop.f32.mrf.mxu0 }
 0x2b6   :  { %496 = vst [vmem:[#allocation10 + $0x8] sm:$0xff] %v492_v2 }
 0x2b7   :  { %767 = shalt.err (!%p764_p10)
}
 0x2b8   :  { %s795_s28 = smov 128   ;;  %s796_s6 = smov 8  }
 0x2b9   :  { %508 = dma.vmem_to_hbm [thread:$0]  %s503_s27, 256, %s895_s7, [#allocation4], %s795_s28, %s795_s28, %s796_s6  }
 0x2ba   :  { %782 = dma.done.wait [#allocation4], 256  }
 0x2bb   :  { %783 = vsyncadd [#allocation4], 4294967040 }
 0x2bc   :  { %512 = vsyncpa [#allocation3], 1 }
 0x2bd   :  { %513 = vsyncpa [#allocation6], 1 }
 0x2be   :  { %514 = vsyncpa [#allocation9], 1 }
 0x2bf   :  { %515 = vsyncpa [#allocation4], 1 }

// kernel: tpu_custom_call.1
= control target key start
LH: loop header
LB: loop body
LE: loop exit
PB: predicated region body
PF: predicated region fallthrough
CT: control target
= control target key end

     0   :  { %12 = vsyncpa [#allocation3], 0  ;;  %s888_s0 = inlined_call_operand.hbm [shape: f32[16,256], index: 0, kind: input, shape index: {}]   ;;  %s889_s1 = inlined_call_operand.hbm [shape: bf16[256,128], index: 1, kind: input, shape index: {}]   ;;  %s890_s2 = inlined_call_operand.vmem [shape: f32[1,128], index: 2, kind: input, shape index: {}]   ;;  %s891_s3 = inlined_call_operand.hbm [shape: bf16[128,128], index: 3, kind: input, shape index: {}]   ;;  %s892_s4 = inlined_call_operand.vmem [shape: f32[1,128], index: 4, kind: input, shape index: {}]   ;;  %s893_s5 = inlined_call_operand.hbm [shape: bf16[128,128], index: 5, kind: input, shape index: {}]   ;;  %s894_s6 = inlined_call_operand.vmem [shape: f32[1,128], index: 6, kind: input, shape index: {}]   ;;  %s895_s7 = inlined_call_operand.hbm [shape: f32[16,128], index: 7, kind: output, shape index: {}]  }
   0x1   :  { %13 = vsyncpa [#allocation6], 0 }
   0x2   :  { %14 = vsyncpa [#allocation9], 0 }
   0x3   :  { %15 = vsyncpa [#allocation4], 0  ;;  %s784_s24 = smov [#allocation5]  }
   0x4   :  { %s33_s25 = sshll.u32 %s784_s24, 4  ;;  %s34_s25 = int_to_ptr.vmem [resolvable:$true] %s33_s25 }
   0x5   :  { %s684_s26 = scalar_lea.vmem %s34_s25, 2048  ;;  %p689_p1 = scmp.lt.s32.totalorder %s34_s25, %s34_s25 }
   0x6   :  { %p685_p0 = scmp.ne.s32.totalorder %s34_s25, %s684_s26  ;;  %p690_p2 = scmp.lt.s32.totalorder %s684_s26, %s684_s26 }
   0x8   :  { %p691_p3 = por %p690_p2, %p689_p1 }
   0xa   :  { %p692_p4 = pnand %p691_p3, %p685_p0 }
   0xc   :  { %695 = shalt.err (!%p692_p4)
}
   0xd   :  { %s785_s27 = smov 64   ;;  %s786_s28 = smov 4  }
   0xe   :  { %39 = dma.hbm_to_vmem [thread:$0]  %s889_s1, 2048, %s34_s25, [#allocation6], %s785_s27, %s785_s27, %s786_s28  }
   0xf   :  { %s787_s8 = smov [#allocation2]  }
  0x10   :  { %s21_s9 = sshll.u32 %s787_s8, 4  ;;  %s22_s9 = int_to_ptr.vmem [resolvable:$true] %s21_s9 }
  0x11   :  { %s704_s10 = scalar_lea.vmem %s22_s9, 512  ;;  %p709_p6 = scmp.lt.s32.totalorder %s22_s9, %s22_s9 }
  0x12   :  { %p705_p5 = scmp.ne.s32.totalorder %s22_s9, %s704_s10  ;;  %p710_p7 = scmp.lt.s32.totalorder %s704_s10, %s704_s10 }
  0x14   :  { %p711_p8 = por %p710_p7, %p709_p6 }
  0x16   :  { %p712_p9 = pnand %p711_p8, %p705_p5 }
  0x18   :  { %715 = shalt.err (!%p712_p9)
}
  0x19   :  { %s788_s11 = smov 256   ;;  %s789_s12 = smov 16  }
  0x1a   :  { %27 = dma.hbm_to_vmem [thread:$0]  %s888_s0, 512, %s22_s9, [#allocation3], %s788_s11, %s788_s11, %s789_s12  }
  0x1b   :  { %s790_s15 = smov [#allocation7]   ;;  %s791_s17 = smov [#allocation8]  }
  0x1c   :  { %s47_s16 = sshll.u32 %s790_s15, 4  ;;  %s61_s1 = sshll.u32 %s791_s17, 4  ;;  %s48_s16 = int_to_ptr.vmem [resolvable:$true] %s47_s16  ;;  %s62_s1 = int_to_ptr.vmem [resolvable:$true] %s61_s1 }
  0x1d   :  { %s724_s18 = scalar_lea.vmem %s48_s16, 1024  ;;  %p729_p11 = scmp.lt.s32.totalorder %s48_s16, %s48_s16 }
  0x1e   :  { %p725_p10 = scmp.ne.s32.totalorder %s48_s16, %s724_s18  ;;  %p730_p12 = scmp.lt.s32.totalorder %s724_s18, %s724_s18 }
  0x20   :  { %p731_p13 = por %p730_p12, %p729_p11 }
  0x22   :  { %p732_p0 = pnand %p731_p13, %p725_p10 }
  0x24   :  { %735 = shalt.err (!%p732_p0)
}
  0x25   :  { %53 = dma.hbm_to_vmem [thread:$0]  %s891_s3, 1024, %s48_s16, [#allocation6], %s785_s27, %s785_s27, %s786_s28  }
  0x26   :  { %s744_s0 = scalar_lea.vmem %s62_s1, 1024  ;;  %p749_p2 = scmp.lt.s32.totalorder %s62_s1, %s62_s1 }
  0x27   :  { %p745_p1 = scmp.ne.s32.totalorder %s62_s1, %s744_s0  ;;  %p750_p3 = scmp.lt.s32.totalorder %s744_s0, %s744_s0 }
  0x29   :  { %p751_p4 = por %p750_p3, %p749_p2 }
  0x2b   :  { %p752_p5 = pnand %p751_p4, %p745_p1 }
  0x2d   :  { %755 = shalt.err (!%p752_p5)
}
  0x2e   :  { %67 = dma.hbm_to_vmem [thread:$0]  %s893_s5, 1024, %s62_s1, [#allocation9], %s785_s27, %s785_s27, %s786_s28  }
  0x2f   :  { %776 = dma.done.wait [#allocation3], 512  }
  0x30   :  { %777 = vsyncadd [#allocation3], 4294966784 }
  0x31   :  { %778 = dma.done.wait [#allocation6], 3072  }
  0x32   :  { %779 = vsyncadd [#allocation6], 4294964224 }
  0x33   :  { %780 = dma.done.wait [#allocation9], 1024  }
  0x34   :  { %781 = vsyncadd [#allocation9], 4294966272  ;;  %v792_v0 = vmov 0.0   ;;  %v644_v1 = vld [vmem:[#allocation5 + $0x78] sm:$0xff]   ;;  %v646_v3 = vld [vmem:[#allocation5 + $0x70] sm:$0xff]   ;;  %vm793_vm0 = vmmov 0  }
  0x35   :  { %591 = vmatprep.subr.bf16.mxu1 %v792_v0  ;;  %v645_v2 = vld [vmem:[#allocation5 + $0x38] sm:$0xff]   ;;  %551 = vmatprep.subr.bf16.mxu0 %v644_v1  ;;  %v647_v4 = vld [vmem:[#allocation5 + $0x30] sm:$0xff]   ;;  %v648_v5 = vld [vmem:[#allocation5 + $0x68] sm:$0xff]   ;;  %s794_s26 = smov [#allocation10]  }
  0x36   :  { %552 = vmatpush3.bf16.msra.mxu0 %v645_v2  ;;  %v649_v6 = vld [vmem:[#allocation5 + $0x28] sm:$0xff]   ;;  %v650_v7 = vld [vmem:[#allocation5 + $0x60] sm:$0xff]   ;;  %v652_v9 = vld [vmem:[#allocation5 + $0x58] sm:$0xff]   ;;  %607 = vmatprep.mubr.msk.bf16.mxu1 %vm793_vm0, %v792_v0  ;;  %s502_s27 = sshll.u32 %s794_s26, 4  ;;  %s503_s27 = int_to_ptr.vmem [resolvable:$true] %s502_s27 }
  0x37   :  { %553 = vmatprep.subr.bf16.mxu0 %v646_v3  ;;  %v651_v8 = vld [vmem:[#allocation5 + $0x20] sm:$0xff]   ;;  %v653_v10 = vld [vmem:[#allocation5 + $0x18] sm:$0xff]   ;;  %v654_v11 = vld [vmem:[#allocation5 + $0x50] sm:$0xff]   ;;  %p761_p7 = scmp.lt.s32.totalorder %s503_s27, %s503_s27 }
  0x38   :  { %v84_v12 = vld [vmem:[#allocation2 + $0x8] sm:$0xff]  ;;  %v86_v13 = vld [vmem:[#allocation2 + $0x18] sm:$0xff]  ;;  %v655_v14 = vld [vmem:[#allocation5 + $0x10] sm:$0xff]  }
  0x39   :  { %v88_v15 = vpack.c.bf16 %v86_v13, %v84_v12  ;;  %v660_v16 = vld [vmem:[#allocation7 + $0x38] sm:$0xff]   ;;  %v656_v17 = vld [vmem:[#allocation5 + $0x48] sm:$0xff]   ;;  %v661_v18 = vld [vmem:[#allocation7 + $0x30] sm:$0xff]  }
  0x3a   :  { %554 = vmatpush3.bf16.msra.mxu0 %v647_v4  ;;  %592 = vmatpush3.bf16.msra.mxu1 %v660_v16  ;;  %v657_v19 = vld [vmem:[#allocation5 + $0x8] sm:$0xff]   ;;  %v658_v20 = vld [vmem:[#allocation5 + $0x40] sm:$0xff]   ;;  %v85_v24 = vld [vmem:[#allocation2 + $0x10] sm:$0xff] }
  0x3b   :  { %555 = vmatprep.subr.bf16.mxu0 %v648_v5  ;;  %256 = vmatprep.mubr.bf16.mxu0 %v88_v15  ;;  %v662_v21 = vld [vmem:[#allocation7 + $0x28] sm:$0xff]   ;;  %v659_v22 = vld [vmem:[#allocation5] sm:$0xff]   ;;  %v664_v27 = vld [vmem:[#allocation7 + $0x18] sm:$0xff]  }
  0x3c   :  { %593 = vmatprep.subr.bf16.mxu1 %v792_v0  ;;  %v83_v23 = vld [vmem:[#allocation2] sm:$0xff]  ;;  %v665_v28 = vld [vmem:[#allocation7 + $0x10] sm:$0xff]   ;;  %v666_v29 = vld [vmem:[#allocation7 + $0x8] sm:$0xff]  }
  0x3d   :  { %v663_v25 = vld [vmem:[#allocation7 + $0x20] sm:$0xff]   ;;  %v87_v26 = vpack.c.bf16 %v85_v24, %v83_v23  ;;  %v668_v31 = vld [vmem:[#allocation8 + $0x38] sm:$0xff]   ;;  %v669_v32 = vld [vmem:[#allocation8 + $0x30] sm:$0xff]  }
  0x3e   :  { %556 = vmatpush3.bf16.msra.mxu0 %v649_v6  ;;  %594 = vmatpush3.bf16.msra.mxu1 %v661_v18  ;;  %v667_v30 = vld [vmem:[#allocation7] sm:$0xff]   ;;  %v670_v33 = vld [vmem:[#allocation8 + $0x28] sm:$0xff]   ;;  %v672_v35 = vld [vmem:[#allocation8 + $0x18] sm:$0xff]  }
  0x3f   :  { %557 = vmatprep.subr.bf16.mxu0 %v650_v7  ;;  %595 = vmatprep.subr.bf16.mxu1 %v792_v0  ;;  %v671_v34 = vld [vmem:[#allocation8 + $0x20] sm:$0xff]   ;;  %v673_v48 = vld [vmem:[#allocation8 + $0x10] sm:$0xff]   ;;  %v674_v49 = vld [vmem:[#allocation8 + $0x8] sm:$0xff]  }
  0x40   :  { %v516_v39 = vld [vmem:[%s890_s2] ss:$0 sm:$0xff] }
  0x41   :  { %v675_v50 = vld [vmem:[#allocation8] sm:$0xff]  }
  0x42   :  { %558 = vmatpush3.bf16.msra.mxu0 %v651_v8  ;;  %596 = vmatpush3.bf16.msra.mxu1 %v662_v21  ;;  %v533_v51 = vld [vmem:[%s892_s4] ss:$0 sm:$0xff]  ;;  %s756_s4 = scalar_lea.vmem %s503_s27, 256 }
  0x43   :  { %559 = vmatprep.subr.bf16.mxu0 %v652_v9  ;;  %597 = vmatprep.subr.bf16.mxu1 %v792_v0  ;;  %v542_v61 = vld [vmem:[%s894_s6] ss:$0 sm:$0xff]  ;;  %p757_p6 = scmp.ne.s32.totalorder %s503_s27, %s756_s4  ;;  %p762_p8 = scmp.lt.s32.totalorder %s756_s4, %s756_s4 }
  0x45   :  { %p763_p9 = por %p762_p8, %p761_p7 }
  0x46   :  { %560 = vmatpush3.bf16.msra.mxu0 %v653_v10  ;;  %598 = vmatpush3.bf16.msra.mxu1 %v663_v25 }
  0x47   :  { %561 = vmatprep.subr.bf16.mxu0 %v654_v11  ;;  %599 = vmatprep.subr.bf16.mxu1 %v792_v0  ;;  %p764_p10 = pnand %p763_p9, %p757_p6 }
  0x4a   :  { %562 = vmatpush3.bf16.msra.mxu0 %v655_v14  ;;  %600 = vmatpush3.bf16.msra.mxu1 %v664_v27 }
  0x4b   :  { %563 = vmatprep.subr.bf16.mxu0 %v656_v17  ;;  %601 = vmatprep.subr.bf16.mxu1 %v792_v0 }
  0x4e   :  { %564 = vmatpush3.bf16.msra.mxu0 %v657_v19  ;;  %602 = vmatpush3.bf16.msra.mxu1 %v665_v28 }
  0x4f   :  { %565 = vmatprep.subr.bf16.mxu0 %v658_v20  ;;  %603 = vmatprep.subr.bf16.mxu1 %v792_v0 }
  0x52   :  { %566 = vmatpush3.bf16.msra.mxu0 %v659_v22  ;;  %604 = vmatpush3.bf16.msra.mxu1 %v666_v29 }
  0x53   :  { %611 = vmatprep.subr.bf16.mxu0 %v792_v0  ;;  %605 = vmatprep.subr.bf16.mxu1 %v792_v0 }
  0x55   :  { %257 = vmatmul.mubr.bf16.vlgmr.msra.gmra.mxu0 %v87_v26 }
  0x56   :  { %606 = vmatpush3.bf16.msra.mxu1 %v667_v30  ;;  %627 = vmatprep.mubr.msk.bf16.mxu0 %vm793_vm0, %v792_v0 }
  0x57   :  { %612 = vmatpush3.bf16.msra.mxu0 %v668_v31 }
  0x58   :  { %613 = vmatprep.subr.bf16.mxu0 %v792_v0 }
  0x5b   :  { %614 = vmatpush3.bf16.msra.mxu0 %v669_v32 }
  0x5c   :  { %615 = vmatprep.subr.bf16.mxu0 %v792_v0 }
  0x5f   :  { %616 = vmatpush3.bf16.msra.mxu0 %v670_v33 }
  0x60   :  { %617 = vmatprep.subr.bf16.mxu0 %v792_v0 }
  0x63   :  { %618 = vmatpush3.bf16.msra.mxu0 %v671_v34 }
  0x64   :  { %619 = vmatprep.subr.bf16.mxu0 %v792_v0 }
  0x67   :  { %620 = vmatpush3.bf16.msra.mxu0 %v672_v35 }
  0x68   :  { %621 = vmatprep.subr.bf16.mxu0 %v792_v0 }
  0x6b   :  { %622 = vmatpush3.bf16.msra.mxu0 %v673_v48 }
  0x6c   :  { %623 = vmatprep.subr.bf16.mxu0 %v792_v0 }
  0x6f   :  { %624 = vmatpush3.bf16.msra.mxu0 %v674_v49 }
  0x70   :  { %625 = vmatprep.subr.bf16.mxu0 %v792_v0 }
  0x73   :  { %626 = vmatpush3.bf16.msra.mxu0 %v675_v50 }
 0x115   :  { %v567_v36 = vpop.f32.mrf.mxu0 }
 0x117   :  { %v568_v37 = vpop.f32.mrf.mxu0 }
 0x118   :  { %v569_v38 = vadd.f32 %v568_v37, %v567_v36 }
 0x119   :  { %v570_v40 = vpop.f32.mrf.mxu0 }
 0x11a   :  { %v259_v42 = vadd.f32 %v569_v38, %v516_v39 }
 0x11b   :  { %v571_v41 = vpop.f32.mrf.mxu0 }
 0x11c   :  { %v572_v43 = vadd.f32 %v571_v41, %v570_v40  ;;  %v265_v45 = vmax.f32 %v259_v42, 0.0 }
 0x11e   :  { %v262_v44 = vadd.f32 %v572_v43, %v516_v39 }
 0x120   :  { %v266_v46 = vmax.f32 %v262_v44, 0.0 }
 0x122   :  { %v267_v47 = vpack.c.bf16 %v266_v46, %v265_v45 }
 0x124   :  { %608 = vmatmul.mubr.bf16.vlgmr.msra.gmra.mxu1 %v267_v47 }
 0x1e4   :  { %v373_v52 = vpop.f32.mrf.mxu1 }
 0x1e5   :  { %v374_v54 = vadd.f32 %v533_v51, %v373_v52 }
 0x1e6   :  { %v609_v53 = vpop.f32.mrf.mxu1 }
 0x1e7   :  { %v380_v58 = vmax.f32 %v374_v54, 0.0 }
 0x1e8   :  { %v376_v55 = vpop.f32.mrf.mxu1 }
 0x1e9   :  { %v377_v56 = vadd.f32 %v533_v51, %v376_v55 }
 0x1ea   :  { %v610_v57 = vpop.f32.mrf.mxu1 }
 0x1eb   :  { %v381_v59 = vmax.f32 %v377_v56, 0.0 }
 0x1ed   :  { %v382_v60 = vpack.c.bf16 %v381_v59, %v380_v58 }
 0x1ef   :  { %628 = vmatmul.mubr.bf16.vlgmr.msra.gmra.mxu0 %v382_v60 }
 0x2af   :  { %v488_v62 = vpop.f32.mrf.mxu0 }
 0x2b0   :  { %v489_v63 = vadd.f32 %v542_v61, %v488_v62 }
 0x2b1   :  { %v629_v0 = vpop.f32.mrf.mxu0 }
 0x2b2   :  { %495 = vst [vmem:[#allocation10] sm:$0xff] %v489_v63 }
 0x2b3   :  { %v491_v1 = vpop.f32.mrf.mxu0 }
 0x2b4   :  { %v492_v2 = vadd.f32 %v542_v61, %v491_v1 }
 0x2b5   :  { %v630_v3 = vpop.f32.mrf.mxu0 }
 0x2b6   :  { %496 = vst [vmem:[#allocation10 + $0x8] sm:$0xff] %v492_v2 }
 0x2b7   :  { %767 = shalt.err (!%p764_p10)
}
 0x2b8   :  { %s795_s28 = smov 128   ;;  %s796_s6 = smov 8  }
 0x2b9   :  { %508 = dma.vmem_to_hbm [thread:$0]  %s503_s27, 256, %s895_s7, [#allocation4], %s795_s28, %s795_s28, %s796_s6  }
 0x2ba   :  { %782 = dma.done.wait [#allocation4], 256  }
 0x2bb   :  { %783 = vsyncadd [#allocation4], 4294967040 }
 0x2bc   :  { %512 = vsyncpa [#allocation3], 1 }
 0x2bd   :  { %513 = vsyncpa [#allocation6], 1 }
 0x2be   :  { %514 = vsyncpa [#allocation9], 1 }
 0x2bf   :  { %515 = vsyncpa [#allocation4], 1 }

</bundles_post_ra>
